<compile_context>
chip_gen: v6e
topology: v6e:2x2x1
jax: 0.10.0
libtpu: 0.0.40
codegen_flags: <defaults>
</compile_context>

<pallas_src>
import numpy as np

import jax
import jax.numpy as jnp
from jax import lax
from jax.experimental import pallas as pl
from jax.experimental.pallas import tpu as pltpu


# ------------------------------ fused kernel ------------------------------- #
def _build_kernel(H, W, C1, C2, KH, n_out):
    H2, W2 = H // 2, W // 2
    Hf = H // 4

    def kernel(x_ref, w1b_ref, w1s_ref, b1r_ref, w2b_ref, w2s_ref, b2r_ref,
               wl_ref, bl_ref, o_ref, hp1_ref, xp2_ref, hp2_ref):
        f32, bf16 = jnp.float32, jnp.bfloat16

        # ---- conv1 (3 banded matmuls) + right-shifted twin ------------------
        a = jnp.dot(x_ref[0], w1b_ref[0], preferred_element_type=f32)
        s = jnp.dot(x_ref[0], w1s_ref[0], preferred_element_type=f32)
        for i in range(1, KH):
            xi = x_ref[i]
            a = a + jnp.dot(xi, w1b_ref[i], preferred_element_type=f32)
            s = s + jnp.dot(xi, w1s_ref[i], preferred_element_type=f32)
        # horizontal 2x2 max; bias is per-channel so it is added once after.
        hp1_ref[...] = jnp.maximum(a, s) + b1r_ref[...]            # (H, W*C1)

        # ---- vertical 2x2 max (sublane-strided loads) -> pool1 output -------
        v1 = jnp.maximum(hp1_ref[pl.ds(0, H2, 2), :],
                         hp1_ref[pl.ds(1, H2, 2), :])               # (H2, W*C1)

        # conv2 padded input: one zero row top/bottom + the pooled rows.
        zrow = jnp.zeros((1, W * C1), f32)
        xp2_ref[0:1, :] = zrow
        xp2_ref[H2 + 1:H2 + 2, :] = zrow
        xp2_ref[1:H2 + 1, :] = v1

        # ---- conv2 (3 banded matmuls) + right-shifted twin -------------------
        p0 = xp2_ref[0:H2, :].astype(bf16)
        c = jnp.dot(p0, w2b_ref[0], preferred_element_type=f32)
        t = jnp.dot(p0, w2s_ref[0], preferred_element_type=f32)
        for i in range(1, KH):
            pi = xp2_ref[i:i + H2, :].astype(bf16)
            c = c + jnp.dot(pi, w2b_ref[i], preferred_element_type=f32)
            t = t + jnp.dot(pi, w2s_ref[i], preferred_element_type=f32)
        hp2_ref[...] = jnp.maximum(c, t) + b2r_ref[...]             # (H2, W2*C2)

        # ---- vertical half of pool2 ------------------------------------------
        v2 = jnp.maximum(hp2_ref[pl.ds(0, Hf, 2), :],
                         hp2_ref[pl.ds(1, Hf, 2), :])               # (Hf, W2*C2)

        # ---- flatten + linear (concat over batches_2 and the stride-2 column
        #      selection of pool2 are folded into wl_ref) ----------------------
        out = bl_ref[...]                                           # (1, n_out)
        for h in range(Hf):
            out = out + jnp.dot(v2[h:h + 1, :].astype(bf16), wl_ref[h],
                                preferred_element_type=f32)
        o_ref[...] = out

    return kernel


# ------------------------ one-time weight re-layout ------------------------- #
def prepare_params(params, batches_2, H, W):
    """Host-side, one-time: banded conv matrices (with padding, the horizontal
    pool shift and the stride-2 column selection folded in), tiled biases, and
    the concat-folded linear weight."""
    w1 = np.asarray(params["w1"], np.float32)      # (C1, Cin, 3, 3)
    b1 = np.asarray(params["b1"], np.float32)
    w2 = np.asarray(params["w2"], np.float32)      # (C2, C1, 3, 3)
    b2 = np.asarray(params["b2"], np.float32)
    wl = np.asarray(params["wl"], np.float32)      # (batches_2*C2*Hf*Wf, n_out)
    bl = np.asarray(params["bl"], np.float32)

    C1, Cin, KH, KW = w1.shape
    C2 = w2.shape[0]
    n_out = wl.shape[1]
    assert H % 4 == 0 and W % 4 == 0 and KH == 3 and KW == 3  # pad=1 3x3 convs
    H2, W2 = H // 2, W // 2
    Hf, Wf = H // 4, W // 4

    # conv1 bands over the zero-padded input rows (lane = p*Cin+ci, p=0..W+1).
    # shift=0: output block q = conv output at width q   (lane = q*C1+co)
    # shift=1: output block q = conv output at width q+1 (right neighbour for
    #          the horizontal half of the 2x2 max-pool).
    def conv1_bands(shift):
        bands = np.zeros((KH, (W + 2) * Cin, W * C1), np.float32)
        for i in range(KH):
            for j in range(KW):
                wt = w1[:, :, i, j].T                       # (Cin, C1)
                for q in range(W):
                    p = q + j + shift
                    if 0 <= p < W + 2:
                        bands[i, p * Cin:(p + 1) * Cin,
                              q * C1:(q + 1) * C1] += wt
        return bands

    # conv2 bands over the pooled conv1 map kept in its "wide" layout
    # (lane = qw*C1+ci, valid data only at even qw = 2*pool_col); horizontal
    # zero padding and the stride-2 column selection are folded in here.
    def conv2_bands(shift):
        bands = np.zeros((KH, W * C1, W2 * C2), np.float32)
        for i in range(KH):
            for j in range(KW):
                wt = w2[:, :, i, j].T                       # (C1, C2)
                for wo in range(W2):
                    u = wo + j - 1 + shift                  # pooled input col
                    if 0 <= u < W2:
                        bands[i, (2 * u) * C1:(2 * u + 1) * C1,
                              wo * C2:(wo + 1) * C2] += wt
        return bands

    w1b, w1s = conv1_bands(0), conv1_bands(1)
    w2b, w2s = conv2_bands(0), conv2_bands(1)
    b1r = np.tile(b1, W)[None, :]                           # (1, W*C1)
    b2r = np.tile(b2, W2)[None, :]                          # (1, W2*C2)

    # Fold cat([conv2(x)]*batches_2, dim=1): the copies are identical, so the
    # per-copy linear weights can be summed exactly.  Also fold pool2's
    # stride-2 column selection (zero rows at odd width blocks) and the
    # PyTorch flatten order (copy, channel, h, w).
    wl_sum = wl.reshape(batches_2, C2, Hf, Wf, n_out).sum(axis=0)  # (C2,Hf,Wf,o)
    wlr = np.zeros((Hf, W2 * C2, n_out), np.float32)
    for p in range(Wf):
        for c in range(C2):
            wlr[:, (2 * p) * C2 + c, :] = wl_sum[c, :, p, :]
    blr = bl[None, :]

    bf16 = jnp.bfloat16
    return dict(
        w1b=jnp.asarray(w1b, bf16), w1s=jnp.asarray(w1s, bf16),
        b1r=jnp.asarray(b1r, jnp.float32),
        w2b=jnp.asarray(w2b, bf16), w2s=jnp.asarray(w2s, bf16),
        b2r=jnp.asarray(b2r, jnp.float32),
        wlr=jnp.asarray(wlr, bf16), blr=jnp.asarray(blr, jnp.float32),
    )


# -------------------------------- forward ----------------------------------- #
@jax.jit
def model_forward(x_nchw, prepped):
    N, Cin, H, W = x_nchw.shape
    w1b, w1s, b1r = prepped["w1b"], prepped["w1s"], prepped["b1r"]
    w2b, w2s, b2r = prepped["w2b"], prepped["w2s"], prepped["b2r"]
    wlr, blr = prepped["wlr"], prepped["blr"]
    KH = w1b.shape[0]
    Win = (W + 2) * Cin
    C1 = w1b.shape[2] // W
    H2, W2 = H // 2, W // 2
    Hf = H // 4
    C2 = w2b.shape[2] // W2
    n_out = blr.shape[1]

    # Layout plumbing only: NCHW -> zero-padded row-2D, pre-split by conv
    # kernel row (so every conv1 LHS load is a full aligned block), bf16.
    x_nhwc = jnp.transpose(x_nchw, (0, 2, 3, 1)).astype(jnp.float32)
    x_pad = jnp.pad(x_nhwc, ((0, 0), (1, 1), (1, 1), (0, 0)))
    x_rows = x_pad.reshape(N, H + 2, Win)
    x3 = jnp.stack([x_rows[:, i:i + H, :] for i in range(KH)],
                   axis=1).astype(jnp.bfloat16)             # (N, KH, H, Win)

    kernel = _build_kernel(H, W, C1, C2, KH, n_out)

    out = pl.pallas_call(
        kernel,
        out_shape=jax.ShapeDtypeStruct((N, 1, n_out), jnp.float32),
        grid=(N,),
        in_specs=[
            pl.BlockSpec((None, KH, H, Win), lambda n: (n, 0, 0, 0)),      # x
            pl.BlockSpec((KH, Win, W * C1), lambda n: (0, 0, 0)),          # w1b
            pl.BlockSpec((KH, Win, W * C1), lambda n: (0, 0, 0)),          # w1s
            pl.BlockSpec((1, W * C1), lambda n: (0, 0)),                   # b1r
            pl.BlockSpec((KH, W * C1, W2 * C2), lambda n: (0, 0, 0)),      # w2b
            pl.BlockSpec((KH, W * C1, W2 * C2), lambda n: (0, 0, 0)),      # w2s
            pl.BlockSpec((1, W2 * C2), lambda n: (0, 0)),                  # b2r
            pl.BlockSpec((Hf, W2 * C2, n_out), lambda n: (0, 0, 0)),       # wlr
            pl.BlockSpec((1, n_out), lambda n: (0, 0)),                    # blr
        ],
        out_specs=pl.BlockSpec((None, 1, n_out), lambda n: (n, 0, 0)),
        scratch_shapes=[
            pltpu.VMEM((H, W * C1), jnp.float32),        # conv1 out (h-pooled)
            pltpu.VMEM((H2 + 2, W * C1), jnp.float32),   # padded conv2 input
            pltpu.VMEM((H2, W2 * C2), jnp.float32),      # conv2 out (h-pooled)
        ],
        compiler_params=pltpu.CompilerParams(
            # On v7x, pltpu.CORE_PARALLEL would pin one batch element per
            # TensorCore; "parallel" is the portable choice for v5e/v6e/v7x.
            dimension_semantics=("parallel",),
        ),
    )(x3, w1b, w1s, b1r, w2b, w2s, b2r, wlr, blr)

    return out.reshape(N, n_out)


# ------------------------------- reference ---------------------------------- #
def reference_forward(x_nchw, params, batches_2):
    def conv(x, w, b, pad):
        out = lax.conv_general_dilated(
            x, w, window_strides=(1, 1), padding=[(pad, pad), (pad, pad)],
            dimension_numbers=("NCHW", "OIHW", "NCHW"),
        )
        return out + b[None, :, None, None]

    def pool(x):
        return lax.reduce_window(x, -jnp.inf, lax.max,
                                 (1, 1, 2, 2), (1, 1, 2, 2), "VALID")

    x = pool(conv(x_nchw, params["w1"], params["b1"], 1))
    y = conv(x, params["w2"], params["b2"], 1)
    x = pool(jnp.concatenate([y] * batches_2, axis=1))
    flat = x.reshape(x.shape[0], -1)
    return flat @ params["wl"] + params["bl"]


if __name__ == "__main__":
    # Model(c1=Conv2d(4,8,3,pad=1), mp1=MaxPool2d(2), c2=Conv2d(8,8,3,pad=1),
    #       mp2=MaxPool2d(2), batches_2=2, last=Flatten+Linear(256,10)).
    # (.cuda() / print_shape are host-side no-ops.)
    N, Cin, H, W = 2, 4, 16, 16
    C1, C2, batches_2, n_out = 8, 8, 2, 10

    key = jax.random.PRNGKey(0)
    k = jax.random.split(key, 7)
    x = jax.random.normal(k[0], (N, Cin, H, W), jnp.float32)
    params = {
        "w1": 0.1 * jax.random.normal(k[1], (C1, Cin, 3, 3), jnp.float32),
        "b1": 0.1 * jax.random.normal(k[2], (C1,), jnp.float32),
        "w2": 0.1 * jax.random.normal(k[3], (C2, C1, 3, 3), jnp.float32),
        "b2": 0.1 * jax.random.normal(k[4], (C2,), jnp.float32),
        "wl": 0.1 * jax.random.normal(
            k[5], (batches_2 * C2 * (H // 4) * (W // 4), n_out), jnp.float32),
        "bl": 0.1 * jax.random.normal(k[6], (n_out,), jnp.float32),
    }

    prepped = prepare_params(params, batches_2, H, W)
    out = jax.block_until_ready(model_forward(x, prepped))
    assert out.shape == (N, n_out), out.shape

    ref = reference_forward(x, params, batches_2)
    err = float(jnp.max(jnp.abs(out - ref)))
    # bf16 MXU operands with f32 accumulation -> ~1e-2 abs error budget.
    assert jnp.allclose(out, ref, atol=5e-2, rtol=5e-2), err
    print("KERNEL_OK")
</pallas_src>

<mosaic_0001>
module attributes {stable_mosaic.version = 11 : i64} {
  func.func @kernel(%arg0: i32, %arg1: memref<1x3x16x72xbf16, #tpu.memory_space<vmem>>, %arg2: memref<3x72x128xbf16, #tpu.memory_space<vmem>>, %arg3: memref<3x72x128xbf16, #tpu.memory_space<vmem>>, %arg4: memref<1x128xf32, #tpu.memory_space<vmem>>, %arg5: memref<3x128x64xbf16, #tpu.memory_space<vmem>>, %arg6: memref<3x128x64xbf16, #tpu.memory_space<vmem>>, %arg7: memref<1x64xf32, #tpu.memory_space<vmem>>, %arg8: memref<4x64x10xbf16, #tpu.memory_space<vmem>>, %arg9: memref<1x10xf32, #tpu.memory_space<vmem>>, %arg10: memref<1x1x10xf32, #tpu.memory_space<vmem>>, %arg11: memref<16x128xf32, #tpu.memory_space<vmem>>, %arg12: memref<10x128xf32, #tpu.memory_space<vmem>>, %arg13: memref<8x64xf32, #tpu.memory_space<vmem>>) attributes {dimension_semantics = [#tpu.dimension_semantics<parallel>], iteration_bounds = array<i64: 2>, scalar_prefetch = 0 : i64, scratch_operands = 3 : i64, tpu.core_type = #tpu.core_type<tc>, window_params = [{transform_indices = @transform_0, window_bounds = array<i64: 1, 3, 16, 72>}, {pipeline_mode = #tpu.pipeline_mode<synchronous>, transform_indices = @transform_1, window_bounds = array<i64: 3, 72, 128>}, {pipeline_mode = #tpu.pipeline_mode<synchronous>, transform_indices = @transform_2, window_bounds = array<i64: 3, 72, 128>}, {pipeline_mode = #tpu.pipeline_mode<synchronous>, transform_indices = @transform_3, window_bounds = array<i64: 1, 128>}, {pipeline_mode = #tpu.pipeline_mode<synchronous>, transform_indices = @transform_4, window_bounds = array<i64: 3, 128, 64>}, {pipeline_mode = #tpu.pipeline_mode<synchronous>, transform_indices = @transform_5, window_bounds = array<i64: 3, 128, 64>}, {pipeline_mode = #tpu.pipeline_mode<synchronous>, transform_indices = @transform_6, window_bounds = array<i64: 1, 64>}, {pipeline_mode = #tpu.pipeline_mode<synchronous>, transform_indices = @transform_7, window_bounds = array<i64: 4, 64, 10>}, {pipeline_mode = #tpu.pipeline_mode<synchronous>, transform_indices = @transform_8, window_bounds = array<i64: 1, 10>}, {transform_indices = @transform_9, window_bounds = array<i64: 1, 1, 10>}]} {
    %c0 = arith.constant 0 : index
    %c0_0 = arith.constant 0 : index
    %c0_1 = arith.constant 0 : index
    %c0_2 = arith.constant 0 : index
    %0 = vector.load %arg1[%c0, %c0_0, %c0_1, %c0_2] : memref<1x3x16x72xbf16, #tpu.memory_space<vmem>>, vector<1x1x16x72xbf16>
    %1 = vector.shape_cast %0 : vector<1x1x16x72xbf16> to vector<16x72xbf16>
    %c0_3 = arith.constant 0 : index
    %c0_4 = arith.constant 0 : index
    %c0_5 = arith.constant 0 : index
    %2 = vector.load %arg2[%c0_3, %c0_4, %c0_5] : memref<3x72x128xbf16, #tpu.memory_space<vmem>>, vector<1x72x128xbf16>
    %3 = vector.shape_cast %2 : vector<1x72x128xbf16> to vector<72x128xbf16>
    %cst = arith.constant dense<0.000000e+00> : vector<16x128xf32>
    %4 = tpu.matmul %1, %3, %cst {dimension_numbers = #tpu.dot_dimension_numbers<[1], [0], [0], [1], [0, 0, 1, 1], [], []>} : vector<16x72xbf16>, vector<72x128xbf16>, vector<16x128xf32> -> vector<16x128xf32>
    %c0_6 = arith.constant 0 : index
    %c0_7 = arith.constant 0 : index
    %c0_8 = arith.constant 0 : index
    %c0_9 = arith.constant 0 : index
    %5 = vector.load %arg1[%c0_6, %c0_7, %c0_8, %c0_9] : memref<1x3x16x72xbf16, #tpu.memory_space<vmem>>, vector<1x1x16x72xbf16>
    %6 = vector.shape_cast %5 : vector<1x1x16x72xbf16> to vector<16x72xbf16>
    %c0_10 = arith.constant 0 : index
    %c0_11 = arith.constant 0 : index
    %c0_12 = arith.constant 0 : index
    %7 = vector.load %arg3[%c0_10, %c0_11, %c0_12] : memref<3x72x128xbf16, #tpu.memory_space<vmem>>, vector<1x72x128xbf16>
    %8 = vector.shape_cast %7 : vector<1x72x128xbf16> to vector<72x128xbf16>
    %cst_13 = arith.constant dense<0.000000e+00> : vector<16x128xf32>
    %9 = tpu.matmul %6, %8, %cst_13 {dimension_numbers = #tpu.dot_dimension_numbers<[1], [0], [0], [1], [0, 0, 1, 1], [], []>} : vector<16x72xbf16>, vector<72x128xbf16>, vector<16x128xf32> -> vector<16x128xf32>
    %c0_14 = arith.constant 0 : index
    %c1 = arith.constant 1 : index
    %c0_15 = arith.constant 0 : index
    %c0_16 = arith.constant 0 : index
    %10 = vector.load %arg1[%c0_14, %c1, %c0_15, %c0_16] : memref<1x3x16x72xbf16, #tpu.memory_space<vmem>>, vector<1x1x16x72xbf16>
    %11 = vector.shape_cast %10 : vector<1x1x16x72xbf16> to vector<16x72xbf16>
    %c1_17 = arith.constant 1 : index
    %c0_18 = arith.constant 0 : index
    %c0_19 = arith.constant 0 : index
    %12 = vector.load %arg2[%c1_17, %c0_18, %c0_19] : memref<3x72x128xbf16, #tpu.memory_space<vmem>>, vector<1x72x128xbf16>
    %13 = vector.shape_cast %12 : vector<1x72x128xbf16> to vector<72x128xbf16>
    %cst_20 = arith.constant dense<0.000000e+00> : vector<16x128xf32>
    %14 = tpu.matmul %11, %13, %cst_20 {dimension_numbers = #tpu.dot_dimension_numbers<[1], [0], [0], [1], [0, 0, 1, 1], [], []>} : vector<16x72xbf16>, vector<72x128xbf16>, vector<16x128xf32> -> vector<16x128xf32>
    %15 = arith.addf %4, %14 : vector<16x128xf32>
    %c1_21 = arith.constant 1 : index
    %c0_22 = arith.constant 0 : index
    %c0_23 = arith.constant 0 : index
    %16 = vector.load %arg3[%c1_21, %c0_22, %c0_23] : memref<3x72x128xbf16, #tpu.memory_space<vmem>>, vector<1x72x128xbf16>
    %17 = vector.shape_cast %16 : vector<1x72x128xbf16> to vector<72x128xbf16>
    %cst_24 = arith.constant dense<0.000000e+00> : vector<16x128xf32>
    %18 = tpu.matmul %11, %17, %cst_24 {dimension_numbers = #tpu.dot_dimension_numbers<[1], [0], [0], [1], [0, 0, 1, 1], [], []>} : vector<16x72xbf16>, vector<72x128xbf16>, vector<16x128xf32> -> vector<16x128xf32>
    %19 = arith.addf %9, %18 : vector<16x128xf32>
    %c0_25 = arith.constant 0 : index
    %c2 = arith.constant 2 : index
    %c0_26 = arith.constant 0 : index
    %c0_27 = arith.constant 0 : index
    %20 = vector.load %arg1[%c0_25, %c2, %c0_26, %c0_27] : memref<1x3x16x72xbf16, #tpu.memory_space<vmem>>, vector<1x1x16x72xbf16>
    %21 = vector.shape_cast %20 : vector<1x1x16x72xbf16> to vector<16x72xbf16>
    %c2_28 = arith.constant 2 : index
    %c0_29 = arith.constant 0 : index
    %c0_30 = arith.constant 0 : index
    %22 = vector.load %arg2[%c2_28, %c0_29, %c0_30] : memref<3x72x128xbf16, #tpu.memory_space<vmem>>, vector<1x72x128xbf16>
    %23 = vector.shape_cast %22 : vector<1x72x128xbf16> to vector<72x128xbf16>
    %cst_31 = arith.constant dense<0.000000e+00> : vector<16x128xf32>
    %24 = tpu.matmul %21, %23, %cst_31 {dimension_numbers = #tpu.dot_dimension_numbers<[1], [0], [0], [1], [0, 0, 1, 1], [], []>} : vector<16x72xbf16>, vector<72x128xbf16>, vector<16x128xf32> -> vector<16x128xf32>
    %25 = arith.addf %15, %24 : vector<16x128xf32>
    %c2_32 = arith.constant 2 : index
    %c0_33 = arith.constant 0 : index
    %c0_34 = arith.constant 0 : index
    %26 = vector.load %arg3[%c2_32, %c0_33, %c0_34] : memref<3x72x128xbf16, #tpu.memory_space<vmem>>, vector<1x72x128xbf16>
    %27 = vector.shape_cast %26 : vector<1x72x128xbf16> to vector<72x128xbf16>
    %cst_35 = arith.constant dense<0.000000e+00> : vector<16x128xf32>
    %28 = tpu.matmul %21, %27, %cst_35 {dimension_numbers = #tpu.dot_dimension_numbers<[1], [0], [0], [1], [0, 0, 1, 1], [], []>} : vector<16x72xbf16>, vector<72x128xbf16>, vector<16x128xf32> -> vector<16x128xf32>
    %29 = arith.addf %19, %28 : vector<16x128xf32>
    %30 = arith.maximumf %25, %29 : vector<16x128xf32>
    %c0_36 = arith.constant 0 : index
    %c0_37 = arith.constant 0 : index
    %31 = vector.load %arg4[%c0_36, %c0_37] : memref<1x128xf32, #tpu.memory_space<vmem>>, vector<1x128xf32>
    %32 = vector.broadcast %31 : vector<1x128xf32> to vector<16x128xf32>
    %33 = arith.addf %30, %32 : vector<16x128xf32>
    %c0_38 = arith.constant 0 : index
    %c0_39 = arith.constant 0 : index
    %34 = vector.load %arg11[%c0_38, %c0_39] : memref<16x128xf32, #tpu.memory_space<vmem>>, vector<16x128xf32>
    tpu.vector_store %arg11[%c0_38, %c0_39], %33 {strides = array<i32>} : memref<16x128xf32, #tpu.memory_space<vmem>>, vector<16x128xf32>,
    %c0_40 = arith.constant 0 : index
    %c0_41 = arith.constant 0 : index
    %35 = tpu.strided_load %arg11[%c0_40, %c0_41] {strides = array<i32: 2, 1>} : memref<16x128xf32, #tpu.memory_space<vmem>>, vector<8x128xf32>
    %c1_42 = arith.constant 1 : index
    %c0_43 = arith.constant 0 : index
    %36 = tpu.strided_load %arg11[%c1_42, %c0_43] {strides = array<i32: 2, 1>} : memref<16x128xf32, #tpu.memory_space<vmem>>, vector<8x128xf32>
    %37 = arith.maximumf %35, %36 : vector<8x128xf32>
    %cst_44 = arith.constant 0.000000e+00 : f32
    %38 = vector.broadcast %cst_44 : f32 to vector<1x128xf32>
    %c0_45 = arith.constant 0 : index
    %c0_46 = arith.constant 0 : index
    %39 = vector.load %arg12[%c0_45, %c0_46] : memref<10x128xf32, #tpu.memory_space<vmem>>, vector<1x128xf32>
    tpu.vector_store %arg12[%c0_45, %c0_46], %38 {strides = array<i32>} : memref<10x128xf32, #tpu.memory_space<vmem>>, vector<1x128xf32>,
    %c9 = arith.constant 9 : index
    %c0_47 = arith.constant 0 : index
    %40 = vector.load %arg12[%c9, %c0_47] : memref<10x128xf32, #tpu.memory_space<vmem>>, vector<1x128xf32>
    tpu.vector_store %arg12[%c9, %c0_47], %38 {strides = array<i32>} : memref<10x128xf32, #tpu.memory_space<vmem>>, vector<1x128xf32>,
    %c1_48 = arith.constant 1 : index
    %c0_49 = arith.constant 0 : index
    %41 = vector.load %arg12[%c1_48, %c0_49] : memref<10x128xf32, #tpu.memory_space<vmem>>, vector<8x128xf32>
    tpu.vector_store %arg12[%c1_48, %c0_49], %37 {strides = array<i32>} : memref<10x128xf32, #tpu.memory_space<vmem>>, vector<8x128xf32>,
    %c0_50 = arith.constant 0 : index
    %c0_51 = arith.constant 0 : index
    %42 = vector.load %arg12[%c0_50, %c0_51] : memref<10x128xf32, #tpu.memory_space<vmem>>, vector<8x128xf32>
    %43 = arith.truncf %42 : vector<8x128xf32> to vector<8x128xbf16>
    %c0_52 = arith.constant 0 : index
    %c0_53 = arith.constant 0 : index
    %c0_54 = arith.constant 0 : index
    %44 = vector.load %arg5[%c0_52, %c0_53, %c0_54] : memref<3x128x64xbf16, #tpu.memory_space<vmem>>, vector<1x128x64xbf16>
    %45 = vector.shape_cast %44 : vector<1x128x64xbf16> to vector<128x64xbf16>
    %cst_55 = arith.constant dense<0.000000e+00> : vector<8x64xf32>
    %46 = tpu.matmul %43, %45, %cst_55 {dimension_numbers = #tpu.dot_dimension_numbers<[1], [0], [0], [1], [0, 0, 1, 1], [], []>} : vector<8x128xbf16>, vector<128x64xbf16>, vector<8x64xf32> -> vector<8x64xf32>
    %c0_56 = arith.constant 0 : index
    %c0_57 = arith.constant 0 : index
    %c0_58 = arith.constant 0 : index
    %47 = vector.load %arg6[%c0_56, %c0_57, %c0_58] : memref<3x128x64xbf16, #tpu.memory_space<vmem>>, vector<1x128x64xbf16>
    %48 = vector.shape_cast %47 : vector<1x128x64xbf16> to vector<128x64xbf16>
    %cst_59 = arith.constant dense<0.000000e+00> : vector<8x64xf32>
    %49 = tpu.matmul %43, %48, %cst_59 {dimension_numbers = #tpu.dot_dimension_numbers<[1], [0], [0], [1], [0, 0, 1, 1], [], []>} : vector<8x128xbf16>, vector<128x64xbf16>, vector<8x64xf32> -> vector<8x64xf32>
    %c1_60 = arith.constant 1 : index
    %c0_61 = arith.constant 0 : index
    %50 = vector.load %arg12[%c1_60, %c0_61] : memref<10x128xf32, #tpu.memory_space<vmem>>, vector<8x128xf32>
    %51 = arith.truncf %50 : vector<8x128xf32> to vector<8x128xbf16>
    %c1_62 = arith.constant 1 : index
    %c0_63 = arith.constant 0 : index
    %c0_64 = arith.constant 0 : index
    %52 = vector.load %arg5[%c1_62, %c0_63, %c0_64] : memref<3x128x64xbf16, #tpu.memory_space<vmem>>, vector<1x128x64xbf16>
    %53 = vector.shape_cast %52 : vector<1x128x64xbf16> to vector<128x64xbf16>
    %cst_65 = arith.constant dense<0.000000e+00> : vector<8x64xf32>
    %54 = tpu.matmul %51, %53, %cst_65 {dimension_numbers = #tpu.dot_dimension_numbers<[1], [0], [0], [1], [0, 0, 1, 1], [], []>} : vector<8x128xbf16>, vector<128x64xbf16>, vector<8x64xf32> -> vector<8x64xf32>
    %55 = arith.addf %46, %54 : vector<8x64xf32>
    %c1_66 = arith.constant 1 : index
    %c0_67 = arith.constant 0 : index
    %c0_68 = arith.constant 0 : index
    %56 = vector.load %arg6[%c1_66, %c0_67, %c0_68] : memref<3x128x64xbf16, #tpu.memory_space<vmem>>, vector<1x128x64xbf16>
    %57 = vector.shape_cast %56 : vector<1x128x64xbf16> to vector<128x64xbf16>
    %cst_69 = arith.constant dense<0.000000e+00> : vector<8x64xf32>
    %58 = tpu.matmul %51, %57, %cst_69 {dimension_numbers = #tpu.dot_dimension_numbers<[1], [0], [0], [1], [0, 0, 1, 1], [], []>} : vector<8x128xbf16>, vector<128x64xbf16>, vector<8x64xf32> -> vector<8x64xf32>
    %59 = arith.addf %49, %58 : vector<8x64xf32>
    %c2_70 = arith.constant 2 : index
    %c0_71 = arith.constant 0 : index
    %60 = vector.load %arg12[%c2_70, %c0_71] : memref<10x128xf32, #tpu.memory_space<vmem>>, vector<8x128xf32>
    %61 = arith.truncf %60 : vector<8x128xf32> to vector<8x128xbf16>
    %c2_72 = arith.constant 2 : index
    %c0_73 = arith.constant 0 : index
    %c0_74 = arith.constant 0 : index
    %62 = vector.load %arg5[%c2_72, %c0_73, %c0_74] : memref<3x128x64xbf16, #tpu.memory_space<vmem>>, vector<1x128x64xbf16>
    %63 = vector.shape_cast %62 : vector<1x128x64xbf16> to vector<128x64xbf16>
    %cst_75 = arith.constant dense<0.000000e+00> : vector<8x64xf32>
    %64 = tpu.matmul %61, %63, %cst_75 {dimension_numbers = #tpu.dot_dimension_numbers<[1], [0], [0], [1], [0, 0, 1, 1], [], []>} : vector<8x128xbf16>, vector<128x64xbf16>, vector<8x64xf32> -> vector<8x64xf32>
    %65 = arith.addf %55, %64 : vector<8x64xf32>
    %c2_76 = arith.constant 2 : index
    %c0_77 = arith.constant 0 : index
    %c0_78 = arith.constant 0 : index
    %66 = vector.load %arg6[%c2_76, %c0_77, %c0_78] : memref<3x128x64xbf16, #tpu.memory_space<vmem>>, vector<1x128x64xbf16>
    %67 = vector.shape_cast %66 : vector<1x128x64xbf16> to vector<128x64xbf16>
    %cst_79 = arith.constant dense<0.000000e+00> : vector<8x64xf32>
    %68 = tpu.matmul %61, %67, %cst_79 {dimension_numbers = #tpu.dot_dimension_numbers<[1], [0], [0], [1], [0, 0, 1, 1], [], []>} : vector<8x128xbf16>, vector<128x64xbf16>, vector<8x64xf32> -> vector<8x64xf32>
    %69 = arith.addf %59, %68 : vector<8x64xf32>
    %70 = arith.maximumf %65, %69 : vector<8x64xf32>
    %c0_80 = arith.constant 0 : index
    %c0_81 = arith.constant 0 : index
    %71 = vector.load %arg7[%c0_80, %c0_81] : memref<1x64xf32, #tpu.memory_space<vmem>>, vector<1x64xf32>
    %72 = vector.broadcast %71 : vector<1x64xf32> to vector<8x64xf32>
    %73 = arith.addf %70, %72 : vector<8x64xf32>
    %c0_82 = arith.constant 0 : index
    %c0_83 = arith.constant 0 : index
    %74 = vector.load %arg13[%c0_82, %c0_83] : memref<8x64xf32, #tpu.memory_space<vmem>>, vector<8x64xf32>
    tpu.vector_store %arg13[%c0_82, %c0_83], %73 {strides = array<i32>} : memref<8x64xf32, #tpu.memory_space<vmem>>, vector<8x64xf32>,
    %c0_84 = arith.constant 0 : index
    %c0_85 = arith.constant 0 : index
    %75 = tpu.strided_load %arg13[%c0_84, %c0_85] {strides = array<i32: 2, 1>} : memref<8x64xf32, #tpu.memory_space<vmem>>, vector<4x64xf32>
    %c1_86 = arith.constant 1 : index
    %c0_87 = arith.constant 0 : index
    %76 = tpu.strided_load %arg13[%c1_86, %c0_87] {strides = array<i32: 2, 1>} : memref<8x64xf32, #tpu.memory_space<vmem>>, vector<4x64xf32>
    %77 = arith.maximumf %75, %76 : vector<4x64xf32>
    %c0_88 = arith.constant 0 : index
    %c0_89 = arith.constant 0 : index
    %78 = vector.load %arg9[%c0_88, %c0_89] : memref<1x10xf32, #tpu.memory_space<vmem>>, vector<1x10xf32>
    %79 = vector.extract_strided_slice %77 {offsets = [0, 0], sizes = [1, 64], strides = [1, 1]} : vector<4x64xf32> to vector<1x64xf32>
    %80 = arith.truncf %79 : vector<1x64xf32> to vector<1x64xbf16>
    %c0_90 = arith.constant 0 : index
    %c0_91 = arith.constant 0 : index
    %c0_92 = arith.constant 0 : index
    %81 = vector.load %arg8[%c0_90, %c0_91, %c0_92] : memref<4x64x10xbf16, #tpu.memory_space<vmem>>, vector<1x64x10xbf16>
    %82 = vector.shape_cast %81 : vector<1x64x10xbf16> to vector<64x10xbf16>
    %cst_93 = arith.constant dense<0.000000e+00> : vector<1x10xf32>
    %83 = tpu.matmul %80, %82, %cst_93 {dimension_numbers = #tpu.dot_dimension_numbers<[1], [0], [0], [1], [0, 0, 1, 1], [], []>} : vector<1x64xbf16>, vector<64x10xbf16>, vector<1x10xf32> -> vector<1x10xf32>
    %84 = arith.addf %78, %83 : vector<1x10xf32>
    %85 = vector.extract_strided_slice %77 {offsets = [1, 0], sizes = [1, 64], strides = [1, 1]} : vector<4x64xf32> to vector<1x64xf32>
    %86 = arith.truncf %85 : vector<1x64xf32> to vector<1x64xbf16>
    %c1_94 = arith.constant 1 : index
    %c0_95 = arith.constant 0 : index
    %c0_96 = arith.constant 0 : index
    %87 = vector.load %arg8[%c1_94, %c0_95, %c0_96] : memref<4x64x10xbf16, #tpu.memory_space<vmem>>, vector<1x64x10xbf16>
    %88 = vector.shape_cast %87 : vector<1x64x10xbf16> to vector<64x10xbf16>
    %cst_97 = arith.constant dense<0.000000e+00> : vector<1x10xf32>
    %89 = tpu.matmul %86, %88, %cst_97 {dimension_numbers = #tpu.dot_dimension_numbers<[1], [0], [0], [1], [0, 0, 1, 1], [], []>} : vector<1x64xbf16>, vector<64x10xbf16>, vector<1x10xf32> -> vector<1x10xf32>
    %90 = arith.addf %84, %89 : vector<1x10xf32>
    %91 = vector.extract_strided_slice %77 {offsets = [2, 0], sizes = [1, 64], strides = [1, 1]} : vector<4x64xf32> to vector<1x64xf32>
    %92 = arith.truncf %91 : vector<1x64xf32> to vector<1x64xbf16>
    %c2_98 = arith.constant 2 : index
    %c0_99 = arith.constant 0 : index
    %c0_100 = arith.constant 0 : index
    %93 = vector.load %arg8[%c2_98, %c0_99, %c0_100] : memref<4x64x10xbf16, #tpu.memory_space<vmem>>, vector<1x64x10xbf16>
    %94 = vector.shape_cast %93 : vector<1x64x10xbf16> to vector<64x10xbf16>
    %cst_101 = arith.constant dense<0.000000e+00> : vector<1x10xf32>
    %95 = tpu.matmul %92, %94, %cst_101 {dimension_numbers = #tpu.dot_dimension_numbers<[1], [0], [0], [1], [0, 0, 1, 1], [], []>} : vector<1x64xbf16>, vector<64x10xbf16>, vector<1x10xf32> -> vector<1x10xf32>
    %96 = arith.addf %90, %95 : vector<1x10xf32>
    %97 = vector.extract_strided_slice %77 {offsets = [3, 0], sizes = [1, 64], strides = [1, 1]} : vector<4x64xf32> to vector<1x64xf32>
    %98 = arith.truncf %97 : vector<1x64xf32> to vector<1x64xbf16>
    %c3 = arith.constant 3 : index
    %c0_102 = arith.constant 0 : index
    %c0_103 = arith.constant 0 : index
    %99 = vector.load %arg8[%c3, %c0_102, %c0_103] : memref<4x64x10xbf16, #tpu.memory_space<vmem>>, vector<1x64x10xbf16>
    %100 = vector.shape_cast %99 : vector<1x64x10xbf16> to vector<64x10xbf16>
    %cst_104 = arith.constant dense<0.000000e+00> : vector<1x10xf32>
    %101 = tpu.matmul %98, %100, %cst_104 {dimension_numbers = #tpu.dot_dimension_numbers<[1], [0], [0], [1], [0, 0, 1, 1], [], []>} : vector<1x64xbf16>, vector<64x10xbf16>, vector<1x10xf32> -> vector<1x10xf32>
    %102 = arith.addf %96, %101 : vector<1x10xf32>
    %c0_105 = arith.constant 0 : index
    %c0_106 = arith.constant 0 : index
    %c0_107 = arith.constant 0 : index
    %103 = vector.load %arg10[%c0_105, %c0_106, %c0_107] : memref<1x1x10xf32, #tpu.memory_space<vmem>>, vector<1x1x10xf32>
    %104 = vector.shape_cast %103 : vector<1x1x10xf32> to vector<1x10xf32>
    %105 = vector.shape_cast %102 : vector<1x10xf32> to vector<1x1x10xf32>
    tpu.vector_store %arg10[%c0_105, %c0_106, %c0_107], %105 {strides = array<i32>} : memref<1x1x10xf32, #tpu.memory_space<vmem>>, vector<1x1x10xf32>,
    return
  }
  func.func @transform_0(%arg0: i32) -> (i32, i32, i32, i32) {
    %c0_i32 = arith.constant 0 : i32
    %c0_i32_0 = arith.constant 0 : i32
    %c0_i32_1 = arith.constant 0 : i32
    %c0_i32_2 = arith.constant 0 : i32
    return %arg0, %c0_i32, %c0_i32_0, %c0_i32_1 : i32, i32, i32, i32
  }
  func.func @transform_1(%arg0: i32) -> (i32, i32, i32) {
    %c0_i32 = arith.constant 0 : i32
    %c0_i32_0 = arith.constant 0 : i32
    %c0_i32_1 = arith.constant 0 : i32
    %c0_i32_2 = arith.constant 0 : i32
    return %c0_i32, %c0_i32_0, %c0_i32_1 : i32, i32, i32
  }
  func.func @transform_2(%arg0: i32) -> (i32, i32, i32) {
    %c0_i32 = arith.constant 0 : i32
    %c0_i32_0 = arith.constant 0 : i32
    %c0_i32_1 = arith.constant 0 : i32
    %c0_i32_2 = arith.constant 0 : i32
    return %c0_i32, %c0_i32_0, %c0_i32_1 : i32, i32, i32
  }
  func.func @transform_3(%arg0: i32) -> (i32, i32) {
    %c0_i32 = arith.constant 0 : i32
    %c0_i32_0 = arith.constant 0 : i32
    %c0_i32_1 = arith.constant 0 : i32
    return %c0_i32, %c0_i32_0 : i32, i32
  }
  func.func @transform_4(%arg0: i32) -> (i32, i32, i32) {
    %c0_i32 = arith.constant 0 : i32
    %c0_i32_0 = arith.constant 0 : i32
    %c0_i32_1 = arith.constant 0 : i32
    %c0_i32_2 = arith.constant 0 : i32
    return %c0_i32, %c0_i32_0, %c0_i32_1 : i32, i32, i32
  }
  func.func @transform_5(%arg0: i32) -> (i32, i32, i32) {
    %c0_i32 = arith.constant 0 : i32
    %c0_i32_0 = arith.constant 0 : i32
    %c0_i32_1 = arith.constant 0 : i32
    %c0_i32_2 = arith.constant 0 : i32
    return %c0_i32, %c0_i32_0, %c0_i32_1 : i32, i32, i32
  }
  func.func @transform_6(%arg0: i32) -> (i32, i32) {
    %c0_i32 = arith.constant 0 : i32
    %c0_i32_0 = arith.constant 0 : i32
    %c0_i32_1 = arith.constant 0 : i32
    return %c0_i32, %c0_i32_0 : i32, i32
  }
  func.func @transform_7(%arg0: i32) -> (i32, i32, i32) {
    %c0_i32 = arith.constant 0 : i32
    %c0_i32_0 = arith.constant 0 : i32
    %c0_i32_1 = arith.constant 0 : i32
    %c0_i32_2 = arith.constant 0 : i32
    return %c0_i32, %c0_i32_0, %c0_i32_1 : i32, i32, i32
  }
  func.func @transform_8(%arg0: i32) -> (i32, i32) {
    %c0_i32 = arith.constant 0 : i32
    %c0_i32_0 = arith.constant 0 : i32
    %c0_i32_1 = arith.constant 0 : i32
    return %c0_i32, %c0_i32_0 : i32, i32
  }
  func.func @transform_9(%arg0: i32) -> (i32, i32, i32) {
    %c0_i32 = arith.constant 0 : i32
    %c0_i32_0 = arith.constant 0 : i32
    %c0_i32_1 = arith.constant 0 : i32
    return %arg0, %c0_i32, %c0_i32_0 : i32, i32, i32
  }
}

</mosaic_0001>

<bundles_post_ra>
// kernel: model_forward.1
= control target key start
LH: loop header
LB: loop body
LE: loop exit
PB: predicated region body
PF: predicated region fallthrough
CT: control target
= control target key end

     0   :  { %14 = vsyncpa [#allocation6], 0  ;;  %s3309_s0 = inlined_call_operand.vmem [shape: bf16[2,3,16,72], index: 0, kind: input, shape index: {}]   ;;  %s3310_s1 = inlined_call_operand.vmem [shape: bf16[3,72,128], index: 1, kind: input, shape index: {}]   ;;  %s3311_s2 = inlined_call_operand.vmem [shape: bf16[3,72,128], index: 2, kind: input, shape index: {}]   ;;  %s3312_s3 = inlined_call_operand.vmem [shape: f32[1,128], index: 3, kind: input, shape index: {}]   ;;  %s3313_s4 = inlined_call_operand.vmem [shape: bf16[3,128,64], index: 4, kind: input, shape index: {}]   ;;  %s3314_s5 = inlined_call_operand.vmem [shape: bf16[3,128,64], index: 5, kind: input, shape index: {}]   ;;  %s3315_s6 = inlined_call_operand.vmem [shape: f32[1,64], index: 6, kind: input, shape index: {}]   ;;  %s3316_s7 = inlined_call_operand.vmem [shape: bf16[4,64,10], index: 7, kind: input, shape index: {}]   ;;  %s3317_s8 = inlined_call_operand.vmem [shape: f32[1,10], index: 8, kind: input, shape index: {}]   ;;  %s3318_s9 = inlined_call_operand.hbm [shape: f32[2,1,10], index: 9, kind: output, shape index: {}]  }
   0x1   :  { %16 = vsyncpa [#allocation6 + $0x1], 0  ;;  %s2769_s30 = smov 0   ;;  %s2771_s10 = smov 0  }
   0x2   :  { %s2773_s11 = smov 0   ;;  %s2775_s12 = smov 0  }
   0x3 LB: > { %s2790_s13 = sadd.s32 4294967295, %s2714_s12   ;;  %s1908_s14 = sadd.s32 4294967294, %s2714_s12   ;;  %s2714_s12 = sphi %s2775_s12, %s3324_s12   ;;  %s2710_s11 = sphi %s2773_s11, %s3323_s11   ;;  %s2706_s10 = sphi %s2771_s10, %s3322_s10   ;;  %s2702_s30 = sphi %s2769_s30, %s3321_s30  }
   0x4   : > { %s2794_s15 = sadd.s32 1, %s2714_s12   ;;  %s223_s16 = sadd.s32 1, %s2710_s11 }
   0x5   : > { %s220_s17 = ssub.s32 %s2714_s12, %s2794_s15  ;;  %p233_p0 = scmp.ne.s32.totalorder %s2710_s11, %s2706_s10 }
   0x6   : > { %p221_p1 = scmp.eq.s32.totalorder %s220_s17, 0  ;;  %p234_p2 = scmp.eq.s32.totalorder %s2790_s13, 1 }
   0x7   : > { %p239_p3 = scmp.ne.s32.totalorder %s2706_s10, %s2702_s30  ;;  %p240_p4 = scmp.eq.s32.totalorder %s1908_s14, 1 }
   0x8   : > { %s2805_s18 = scalar_select %p221_p1, %s2710_s11, %s223_s16  }
   0x9   : > { %p2807_p5 = por %p234_p2, %p233_p0  ;;  %p2811_p6 = por %p240_p4, %p239_p3 }
   0xa   : > { %p1911_p7 = scmp.ge.s32.totalorder %s2714_s12, 1  ;;  %p290_p8 = scmp.lt.s32.totalorder %s2714_s12, 3 }
   0xc   : > { %p291_p9 = pnand %p1911_p7, %p290_p8 }
   0xd   : > { %p325_p10 = scmp.lt.s32.totalorder (!%p291_p9), %s2790_s13, 1  ;;  %s2150_s17 = sshll.u32 (!%p291_p9), %s2790_s13, 4 }
   0xe   : > { %294 = sbr.rel (%p291_p9) target bundleno = 805 (0x325), region = 56  ;;  %s3268_s25 = scalar_lea.hbm (!%p291_p9), %s3318_s9, %s2150_s17 }
   0xf   : > { %s2718_s28 = smov (!%p291_p9), [#allocation5]  }
  0x10   : > { %s2658_s29 = sshll.u32 (!%p291_p9), %s2718_s28, 4  ;;  %s2659_s29 = int_to_ptr.vmem [resolvable:$false] %s2658_s29 }
  0x11   : > { %s2660_s14 = scalar_lea.vmem (!%p291_p9), %s2659_s29, 32 }
  0x13   : > { %v2557_v0 = vld [vmem:[%s3310_s1 + $0x44] ss:$0 sps:$4 sm:$0xff]   ;;  %vm400_vm0 = vcmask 1043456   ;;  %v2716_v1 = vmov 0.0   ;;  %v2558_v2 = vld [vmem:[%s3310_s1 + $0x20] ss:$0 sps:$4 sm:$0xff]  }
  0x14   : > { %2263 = vmatprep.subr.bf16.mxu0 %v2716_v1  ;;  %870 = vst [vmem:[#allocation3] sm:$0x1] %v2716_v1  ;;  %871 = vst [vmem:[#allocation3 + $0x9] sm:$0x1] %v2716_v1  ;;  %2277 = vmatprep.subr.bf16.mxu1 %v2716_v1  ;;  %v402_v3 = vsel %vm400_vm0, %v2557_v0, 0  ;;  %v481_v4 = vsel %vm400_vm0, %v2558_v2, 0 }
  0x15   : > { %2264 = vmatpush3.bf16.msra.mxu0 %v402_v3  ;;  %v2559_v5 = vld [vmem:[%s3310_s1 + $0x3c] sm:$0xff]   ;;  %2278 = vmatpush3.bf16.msra.mxu1 %v481_v4  ;;  %vm2717_vm1 = vmmov 0   ;;  %v2561_v7 = vld [vmem:[%s3310_s1 + $0x34] sm:$0xff]   ;;  %s326_s16 = scalar_select %p325_p10, %s2790_s13, 1  ;;  %v2563_v9 = vld [vmem:[%s3310_s1 + $0x2c] sm:$0xff]   ;;  %vm396_vm2 = vcmask 588800  }
  0x16   : > { %2265 = vmatprep.subr.bf16.mxu0 %v2716_v1  ;;  %v2560_v6 = vld [vmem:[%s3310_s1 + $0x18] sm:$0xff]   ;;  %2279 = vmatprep.subr.bf16.mxu1 %v2716_v1  ;;  %v2562_v8 = vld [vmem:[%s3310_s1 + $0x10] sm:$0xff]   ;;  %v2564_v10 = vld [vmem:[%s3310_s1 + $0x8] sm:$0xff]   ;;  %vm1518_vm3 = vcmask 523264   ;;  %vm1838_vm4 = vcmask 73728  }
  0x17   : > { %2273 = vmatprep.mubr.msk.bf16.mxu0 %vm2717_vm1, %v2716_v1  ;;  %2287 = vmatprep.mubr.msk.bf16.mxu1 %vm2717_vm1, %v2716_v1  ;;  %s2515_s22 = smul.u32 24, %s326_s16  ;;  %v2565_v11 = vld [vmem:[%s3310_s1 + $0x24] sm:$0xff]   ;;  %v2570_v14 = vld [vmem:[%s3311_s2 + $0x20] ss:$0 sps:$4 sm:$0xff]   ;;  %v2572_v20 = vld [vmem:[%s3311_s2 + $0x18] sm:$0xff]   ;;  %s323_s16 = sand.u32 1, %s2706_s10  }
  0x18   : > { %v2566_v12 = vld [vmem:[%s3310_s1] sm:$0xff]   ;;  %v633_v18 = vsel %vm400_vm0, %v2570_v14, 0  ;;  %v2573_v21 = vld [vmem:[%s3311_s2 + $0x34] sm:$0xff]   ;;  %v2579_v22 = vld [vmem:[%s3310_s1 + $0x68] ss:$0 sps:$4 sm:$0xff]   ;;  %s324_s21 = scalar_lea.vmem [#allocation5], %s323_s16 }
  0x19   : > { %2266 = vmatpush3.bf16.msra.mxu0 %v2559_v5  ;;  %2280 = vmatpush3.bf16.msra.mxu1 %v2560_v6  ;;  %s2857_s27 = scalar_lea.vmem %s3309_s0, %s2515_s22  ;;  %v2569_v13 = vld [vmem:[%s3311_s2 + $0x44] ss:$0 sps:$4 sm:$0xff]   ;;  %v2571_v19 = vld [vmem:[%s3311_s2 + $0x3c] sm:$0xff]   ;;  %v2580_v23 = vld [vmem:[%s3311_s2 + $0x68] ss:$0 sps:$4 sm:$0xff]   ;;  %v725_v27 = vsel %vm400_vm0, %v2579_v22, 0 }
  0x1a   : > { %2267 = vmatprep.subr.bf16.mxu0 %v2716_v1  ;;  %2281 = vmatprep.subr.bf16.mxu1 %v2716_v1  ;;  %v2567_v15 = vld [vmem:[%s2857_s27 + $0x8] sm:$0xff]   ;;  %v2568_v16 = vld [vmem:[%s2857_s27] sm:$0xff]   ;;  %v562_v17 = vsel %vm400_vm0, %v2569_v13, 0  ;;  %v2574_v24 = vld [vmem:[%s3311_s2 + $0x10] sm:$0xff]   ;;  %v808_v28 = vsel %vm400_vm0, %v2580_v23, 0  ;;  %s1853_s22 = sshll.u32 %s324_s21, 4  ;;  %s3270_s22 = int_to_ptr.vmem [resolvable:$true] %s1853_s22 }
  0x1b   : > { %v2575_v25 = vld [vmem:[%s3311_s2 + $0x2c] sm:$0xff]   ;;  %v2577_v29 = vld [vmem:[%s3311_s2 + $0x24] sm:$0xff]   ;;  %v2583_v33 = vld [vmem:[%s3310_s1 + $0x58] sm:$0xff]   ;;  %s1841_s13 = scalar_lea.sflag [#allocation6], %s323_s16  ;;  %s2654_s26 = scalar_lea.vmem %s3270_s22, 16 }
  0x1c   : > { %v2576_v26 = vld [vmem:[%s3311_s2 + $0x8] sm:$0xff]   ;;  %v2578_v30 = vld [vmem:[%s3311_s2] sm:$0xff]   ;;  %v2584_v34 = vld [vmem:[%s3311_s2 + $0x58] sm:$0xff]   ;;  %p2655_p11 = scmp.ne.s32.totalorder %s3270_s22, %s2654_s26  ;;  %p2661_p0 = scmp.lt.s32.totalorder %s3270_s22, %s2659_s29 }
  0x1d   : > { %2268 = vmatpush3.bf16.msra.mxu0 %v2561_v7  ;;  %2282 = vmatpush3.bf16.msra.mxu1 %v2562_v8  ;;  %v2581_v31 = vld [vmem:[%s3310_s1 + $0x60] sm:$0xff]   ;;  %v2585_v35 = vld [vmem:[%s3310_s1 + $0x50] sm:$0xff]   ;;  %v2587_v37 = vld [vmem:[%s3310_s1 + $0x48] sm:$0xff]   ;;  %p2662_p1 = scmp.lt.s32.totalorder %s2660_s14, %s2654_s26 }
  0x1e   : > { %2269 = vmatprep.subr.bf16.mxu0 %v2716_v1  ;;  %2283 = vmatprep.subr.bf16.mxu1 %v2716_v1  ;;  %v2582_v32 = vld [vmem:[%s3311_s2 + $0x60] sm:$0xff]   ;;  %v2586_v36 = vld [vmem:[%s3311_s2 + $0x50] sm:$0xff]   ;;  %v2588_v38 = vld [vmem:[%s3311_s2 + $0x48] sm:$0xff]   ;;  %p2656_p12 = pnand %p2655_p11, %p2807_p5 }
  0x1f   : > { %v2589_v39 = vld [vmem:[%s2857_s27 + $0x10] sm:$0xff]   ;;  %v2590_v40 = vld [vmem:[%s3313_s4 + $0x78] sm:$0xff]   ;;  %v2594_v43 = vld [vmem:[%s3313_s4 + $0x68] sm:$0xff]   ;;  %p2663_p2 = por %p2662_p1, %p2661_p0 }
  0x20   : > { %v2591_v41 = vld [vmem:[%s3313_s4 + $0x38] sm:$0xff]   ;;  %v2592_v42 = vld [vmem:[%s3313_s4 + $0x70] sm:$0xff]   ;;  %v2596_v45 = vld [vmem:[%s3313_s4 + $0x60] sm:$0xff]   ;;  %p2657_p13 = pneg %p2656_p12 }
  0x21   : > { %2270 = vmatpush3.bf16.msra.mxu0 %v2563_v9  ;;  %2284 = vmatpush3.bf16.msra.mxu1 %v2564_v10  ;;  %v2593_v44 = vld [vmem:[%s3313_s4 + $0x30] sm:$0xff]   ;;  %v2595_v46 = vld [vmem:[%s3313_s4 + $0x28] sm:$0xff]   ;;  %v2598_v47 = vld [vmem:[%s3313_s4 + $0x58] sm:$0xff]  }
  0x22   : > { %2271 = vmatprep.subr.bf16.mxu0 %v2716_v1  ;;  %2285 = vmatprep.subr.bf16.mxu1 %v2716_v1  ;;  %v2597_v48 = vld [vmem:[%s3313_s4 + $0x20] sm:$0xff]   ;;  %v2600_v49 = vld [vmem:[%s3313_s4 + $0x50] sm:$0xff]   ;;  %v2599_v50 = vld [vmem:[%s3313_s4 + $0x18] sm:$0xff]   ;;  %p2664_p3 = pnand %p2663_p2, %p2657_p13 }
  0x23   : > { %v2602_v51 = vld [vmem:[%s3313_s4 + $0x48] sm:$0xff]   ;;  %v2601_v52 = vld [vmem:[%s3313_s4 + $0x10] sm:$0xff]   ;;  %v2604_v53 = vld [vmem:[%s3313_s4 + $0x40] sm:$0xff]  }
  0x24   : > { %v2603_v54 = vld [vmem:[%s3313_s4 + $0x8] sm:$0xff]   ;;  %v2605_v55 = vld [vmem:[%s3313_s4] sm:$0xff]  }
  0x25   : > { %2272 = vmatpush3.bf16.msra.mxu0 %v2565_v11  ;;  %2286 = vmatpush3.bf16.msra.mxu1 %v2566_v12 }
  0x26   : > { %2291 = vmatprep.subr.bf16.mxu0 %v2716_v1  ;;  %2305 = vmatprep.subr.bf16.mxu1 %v2716_v1 }
  0x28   : > { %2274 = vmatmul.mubr.msk.bf16.vlgmr.msra.gmra.mxu0 %vm396_vm2, %v2567_v15  ;;  %2288 = vmatmul.mubr.msk.bf16.vlgmr.msra.gmra.mxu1 %vm396_vm2, %v2568_v16 }
  0x29   : > { %2292 = vmatpush3.bf16.msra.mxu0 %v562_v17  ;;  %2306 = vmatpush3.bf16.msra.mxu1 %v633_v18  ;;  %v1992_v17 = vld [vmem:[%s3312_s3] ss:$0 sm:$0xff] }
  0x2a   : > { %2293 = vmatprep.subr.bf16.mxu0 %v2716_v1  ;;  %2307 = vmatprep.subr.bf16.mxu1 %v2716_v1 }
  0x2b   : > { %2301 = vmatprep.mubr.msk.bf16.mxu0 %vm2717_vm1, %v2716_v1  ;;  %2315 = vmatprep.mubr.msk.bf16.mxu1 %vm2717_vm1, %v2716_v1 }
  0x2d   : > { %2294 = vmatpush3.bf16.msra.mxu0 %v2571_v19  ;;  %2308 = vmatpush3.bf16.msra.mxu1 %v2572_v20 }
  0x2e   : > { %2295 = vmatprep.subr.bf16.mxu0 %v2716_v1  ;;  %2309 = vmatprep.subr.bf16.mxu1 %v2716_v1 }
  0x31   : > { %2296 = vmatpush3.bf16.msra.mxu0 %v2573_v21  ;;  %2310 = vmatpush3.bf16.msra.mxu1 %v2574_v24 }
  0x32   : > { %2297 = vmatprep.subr.bf16.mxu0 %v2716_v1  ;;  %2311 = vmatprep.subr.bf16.mxu1 %v2716_v1 }
  0x35   : > { %2298 = vmatpush3.bf16.msra.mxu0 %v2575_v25  ;;  %2312 = vmatpush3.bf16.msra.mxu1 %v2576_v26 }
  0x36   : > { %2299 = vmatprep.subr.bf16.mxu0 %v2716_v1  ;;  %2313 = vmatprep.subr.bf16.mxu1 %v2716_v1 }
  0x39   : > { %2300 = vmatpush3.bf16.msra.mxu0 %v2577_v29  ;;  %2314 = vmatpush3.bf16.msra.mxu1 %v2578_v30 }
  0x3a   : > { %2319 = vmatprep.subr.bf16.mxu0 %v2716_v1  ;;  %2333 = vmatprep.subr.bf16.mxu1 %v2716_v1 }
  0x3c   : > { %2302 = vmatmul.mubr.msk.bf16.vlgmr.msra.gmra.mxu0 %vm396_vm2, %v2567_v15  ;;  %2316 = vmatmul.mubr.msk.bf16.vlgmr.msra.gmra.mxu1 %vm396_vm2, %v2568_v16 }
  0x3d   : > { %2320 = vmatpush3.bf16.msra.mxu0 %v725_v27  ;;  %2334 = vmatpush3.bf16.msra.mxu1 %v808_v28 }
  0x3e   : > { %2321 = vmatprep.subr.bf16.mxu0 %v2716_v1  ;;  %2335 = vmatprep.subr.bf16.mxu1 %v2716_v1 }
  0x3f   : > { %2329 = vmatprep.mubr.msk.bf16.mxu0 %vm2717_vm1, %v2716_v1  ;;  %2343 = vmatprep.mubr.msk.bf16.mxu1 %vm2717_vm1, %v2716_v1 }
  0x41   : > { %2322 = vmatpush3.bf16.msra.mxu0 %v2581_v31  ;;  %2336 = vmatpush3.bf16.msra.mxu1 %v2582_v32 }
  0x42   : > { %2323 = vmatprep.subr.bf16.mxu0 %v2716_v1  ;;  %2337 = vmatprep.subr.bf16.mxu1 %v2716_v1 }
  0x45   : > { %2324 = vmatpush3.bf16.msra.mxu0 %v2583_v33  ;;  %2338 = vmatpush3.bf16.msra.mxu1 %v2584_v34  ;;  %v2606_v33 = vld [vmem:[%s3314_s5 + $0x78] sm:$0xff]  }
  0x46   : > { %2325 = vmatprep.subr.bf16.mxu0 %v2716_v1  ;;  %2339 = vmatprep.subr.bf16.mxu1 %v2716_v1 }
  0x49   : > { %2326 = vmatpush3.bf16.msra.mxu0 %v2585_v35  ;;  %2340 = vmatpush3.bf16.msra.mxu1 %v2586_v36  ;;  %v2608_v35 = vld [vmem:[%s3314_s5 + $0x70] sm:$0xff]  }
  0x4a   : > { %2327 = vmatprep.subr.bf16.mxu0 %v2716_v1  ;;  %2341 = vmatprep.subr.bf16.mxu1 %v2716_v1 }
  0x4d   : > { %2328 = vmatpush3.bf16.msra.mxu0 %v2587_v37  ;;  %2342 = vmatpush3.bf16.msra.mxu1 %v2588_v38  ;;  %v2607_v37 = vld [vmem:[%s3314_s5 + $0x38] sm:$0xff]   ;;  %v2610_v38 = vld [vmem:[%s3314_s5 + $0x68] sm:$0xff]  }
  0x4e   : > { %2347 = vmatprep.subr.bf16.mxu0 %v2716_v1  ;;  %2367 = vmatprep.subr.bf16.mxu1 %v2716_v1 }
  0x50   : > { %2330 = vmatmul.mubr.msk.bf16.vlgmr.msra.gmra.mxu0 %vm396_vm2, %v2589_v39  ;;  %2344 = vmatmul.mubr.msk.bf16.vlgmr.msra.gmra.mxu1 %vm396_vm2, %v2589_v39 }
  0x51   : > { %2363 = vmatprep.mubr.msk.bf16.mxu0 %vm2717_vm1, %v2716_v1  ;;  %2383 = vmatprep.mubr.msk.bf16.mxu1 %vm2717_vm1, %v2716_v1 }
  0x52   : > { %2348 = vmatpush3.bf16.msra.mxu0 %v2590_v40  ;;  %2368 = vmatpush3.bf16.msra.mxu1 %v2591_v41  ;;  %v2609_v40 = vld [vmem:[%s3314_s5 + $0x30] sm:$0xff]   ;;  %v2612_v41 = vld [vmem:[%s3314_s5 + $0x60] sm:$0xff]  }
  0x53   : > { %2349 = vmatprep.subr.bf16.mxu0 %v2716_v1  ;;  %2369 = vmatprep.subr.bf16.mxu1 %v2716_v1 }
  0x56   : > { %2350 = vmatpush3.bf16.msra.mxu0 %v2592_v42  ;;  %2370 = vmatpush3.bf16.msra.mxu1 %v2593_v44  ;;  %v2611_v42 = vld [vmem:[%s3314_s5 + $0x28] sm:$0xff]   ;;  %v2613_v44 = vld [vmem:[%s3314_s5 + $0x20] sm:$0xff]  }
  0x57   : > { %2351 = vmatprep.subr.bf16.mxu0 %v2716_v1  ;;  %2371 = vmatprep.subr.bf16.mxu1 %v2716_v1 }
  0x5a   : > { %2352 = vmatpush3.bf16.msra.mxu0 %v2594_v43  ;;  %2372 = vmatpush3.bf16.msra.mxu1 %v2595_v46  ;;  %v2614_v43 = vld [vmem:[%s3314_s5 + $0x58] sm:$0xff]  }
  0x5b   : > { %2353 = vmatprep.subr.bf16.mxu0 %v2716_v1  ;;  %2373 = vmatprep.subr.bf16.mxu1 %v2716_v1  ;;  %v2615_v46 = vld [vmem:[%s3314_s5 + $0x18] sm:$0xff]  }
  0x5e   : > { %2354 = vmatpush3.bf16.msra.mxu0 %v2596_v45  ;;  %2374 = vmatpush3.bf16.msra.mxu1 %v2597_v48  ;;  %v2616_v45 = vld [vmem:[%s3314_s5 + $0x50] sm:$0xff]  }
  0x5f   : > { %2355 = vmatprep.subr.bf16.mxu0 %v2716_v1  ;;  %2375 = vmatprep.subr.bf16.mxu1 %v2716_v1  ;;  %v2617_v48 = vld [vmem:[%s3314_s5 + $0x10] sm:$0xff]  }
  0x62   : > { %2356 = vmatpush3.bf16.msra.mxu0 %v2598_v47  ;;  %2376 = vmatpush3.bf16.msra.mxu1 %v2599_v50  ;;  %v2618_v47 = vld [vmem:[%s3314_s5 + $0x48] sm:$0xff]  }
  0x63   : > { %2357 = vmatprep.subr.bf16.mxu0 %v2716_v1  ;;  %2377 = vmatprep.subr.bf16.mxu1 %v2716_v1  ;;  %v2619_v50 = vld [vmem:[%s3314_s5 + $0x8] sm:$0xff]  }
  0x66   : > { %2358 = vmatpush3.bf16.msra.mxu0 %v2600_v49  ;;  %2378 = vmatpush3.bf16.msra.mxu1 %v2601_v52  ;;  %v2620_v49 = vld [vmem:[%s3314_s5 + $0x40] sm:$0xff]  }
  0x67   : > { %2359 = vmatprep.subr.bf16.mxu0 %v2716_v1  ;;  %2379 = vmatprep.subr.bf16.mxu1 %v2716_v1  ;;  %v2621_v52 = vld [vmem:[%s3314_s5] sm:$0xff]  }
  0x6a   : > { %2360 = vmatpush3.bf16.msra.mxu0 %v2602_v51  ;;  %2380 = vmatpush3.bf16.msra.mxu1 %v2603_v54  ;;  %v2622_v51 = vld [vmem:[%s3313_s4 + $0xb8] sm:$0xff]  }
  0x6b   : > { %2361 = vmatprep.subr.bf16.mxu0 %v2716_v1  ;;  %2381 = vmatprep.subr.bf16.mxu1 %v2716_v1  ;;  %v2623_v54 = vld [vmem:[%s3314_s5 + $0xb8] sm:$0xff]  }
  0x6e   : > { %2362 = vmatpush3.bf16.msra.mxu0 %v2604_v53  ;;  %2382 = vmatpush3.bf16.msra.mxu1 %v2605_v55  ;;  %v2624_v53 = vld [vmem:[%s3313_s4 + $0xb0] sm:$0xff]   ;;  %v2626_v55 = vld [vmem:[%s3313_s4 + $0xa8] sm:$0xff]  }
  0x6f   : > { %2387 = vmatprep.subr.bf16.mxu0 %v2716_v1  ;;  %2407 = vmatprep.subr.bf16.mxu1 %v2716_v1 }
  0xe8   : > { %v438_v56 = vpop.f32.mrf.mxu0  ;;  %v517_v57 = vpop.f32.mrf.mxu1 }
  0xe9   : > { %v518_v9 = vadd.f32 %v517_v57, %v438_v56  ;;  %v2625_v56 = vld [vmem:[%s3314_s5 + $0xb0] sm:$0xff]   ;;  %v2628_v57 = vld [vmem:[%s3313_s4 + $0xa0] sm:$0xff]  }
  0xea   : > { %v2275_v58 = vpop.f32.mrf.mxu0  ;;  %v2289_v59 = vpop.f32.mrf.mxu1 }
  0xeb   : > { %v2627_v58 = vld [vmem:[%s3314_s5 + $0xa8] sm:$0xff]   ;;  %v2630_v59 = vld [vmem:[%s3313_s4 + $0x98] sm:$0xff]  }
  0xec   : > { %v441_v60 = vpop.f32.mrf.mxu0  ;;  %v520_v61 = vpop.f32.mrf.mxu1 }
  0xed   : > { %v521_v16 = vadd.f32 %v520_v61, %v441_v60  ;;  %v2629_v60 = vld [vmem:[%s3314_s5 + $0xa0] sm:$0xff]   ;;  %v2632_v61 = vld [vmem:[%s3313_s4 + $0x90] sm:$0xff]  }
  0xee   : > { %v2276_v62 = vpop.f32.mrf.mxu0  ;;  %v2290_v63 = vpop.f32.mrf.mxu1 }
  0xef   : > { %v2631_v62 = vld [vmem:[%s3314_s5 + $0x98] sm:$0xff]   ;;  %v2634_v63 = vld [vmem:[%s3313_s4 + $0x88] sm:$0xff]  }
  0xfc   : > { %v598_v0 = vpop.f32.mrf.mxu0  ;;  %v669_v2 = vpop.f32.mrf.mxu1 }
  0xfd   : > { %v670_v10 = vadd.f32 %v669_v2, %v598_v0  ;;  %v2633_v0 = vld [vmem:[%s3314_s5 + $0x90] sm:$0xff]   ;;  %v2636_v2 = vld [vmem:[%s3313_s4 + $0x80] sm:$0xff]  }
  0xfe   : > { %v2303_v3 = vpop.f32.mrf.mxu0  ;;  %v2317_v4 = vpop.f32.mrf.mxu1 }
  0xff   : > { %v2635_v4 = vld [vmem:[%s3314_s5 + $0x88] sm:$0xff]  }
 0x100   : > { %v601_v5 = vpop.f32.mrf.mxu0  ;;  %v672_v6 = vpop.f32.mrf.mxu1 }
 0x101   : > { %v673_v19 = vadd.f32 %v672_v6, %v601_v5  ;;  %v2637_v6 = vld [vmem:[%s3314_s5 + $0x80] sm:$0xff]  }
 0x102   : > { %v2304_v7 = vpop.f32.mrf.mxu0  ;;  %v2318_v8 = vpop.f32.mrf.mxu1 }
 0x103   : > { %v2638_v7 = vld [vmem:[%s3316_s7 + $0x18] sm:$0xff]  }
 0x104   : > { %v2639_v8 = vld [vmem:[%s3316_s7 + $0x38] sm:$0xff]  }
 0x110   : > { %v761_v11 = vpop.f32.mrf.mxu0  ;;  %v844_v13 = vpop.f32.mrf.mxu1 }
 0x111   : > { %v768_v12 = vadd.f32 %v761_v11, %v518_v9  ;;  %v851_v14 = vadd.f32 %v844_v13, %v670_v10  ;;  %v2640_v9 = vld [vmem:[%s3316_s7 + $0x10] sm:$0xff]   ;;  %v2642_v11 = vld [vmem:[%s3316_s7 + $0x8] sm:$0xff]   ;;  %v2644_v13 = vld [vmem:[%s3316_s7] sm:$0xff]  }
 0x112   : > { %v2331_v15 = vpop.f32.mrf.mxu0  ;;  %v2345_v18 = vpop.f32.mrf.mxu1  ;;  %v2641_v10 = vld [vmem:[%s3316_s7 + $0x30] sm:$0xff]  }
 0x113   : > { %v853_v20 = vmax.f32 %v768_v12, %v851_v14  ;;  %v2643_v12 = vld [vmem:[%s3316_s7 + $0x28] sm:$0xff]   ;;  %v2645_v14 = vld [vmem:[%s3316_s7 + $0x20] sm:$0xff]  }
 0x114   : > { %v764_v21 = vpop.f32.mrf.mxu0  ;;  %v847_v23 = vpop.f32.mrf.mxu1 }
 0x115   : > { %v769_v22 = vadd.f32 %v764_v21, %v521_v16  ;;  %v862_v24 = vadd.f32 %v1992_v17, %v853_v20  ;;  %v852_v25 = vadd.f32 %v847_v23, %v673_v19 }
 0x116   : > { %v2332_v26 = vpop.f32.mrf.mxu0  ;;  %v2346_v27 = vpop.f32.mrf.mxu1 }
 0x117   : > { %864 = vst [vmem:[#allocation2] sm:$0xff] %v862_v24  ;;  %v854_v28 = vmax.f32 %v769_v22, %v852_v25 }
 0x119   : > { %v863_v29 = vadd.f32 %v1992_v17, %v854_v28 }
 0x11b   : > { %865 = vst [vmem:[#allocation2 + $0x8] sm:$0xff] %v863_v29 }
 0x122   : > { %v866_v30 = vld [vmem:[#allocation2] ss:$2 sm:$0xff]  ;;  %v868_v31 = vld [vmem:[#allocation2 + $0x1] ss:$2 sm:$0xff] }
 0x123   : > { %v869_v32 = vmax.f32 %v866_v30, %v868_v31 }
 0x125   : > { %872 = vst [vmem:[#allocation3 + $0x1] sm:$0xff] %v869_v32  ;;  %v908_v34 = vpack.c.bf16 %v869_v32, %v869_v32 }
 0x127   : > { %2364 = vmatmul.mubr.bf16.vlgmr.msra.gmra.mxu0 %v908_v34 }
 0x128   : > { %2388 = vmatpush3.bf16.msra.mxu0 %v2606_v33  ;;  %2403 = vmatprep.mubr.msk.bf16.mxu0 %vm2717_vm1, %v2716_v1 }
 0x129   : > { %2389 = vmatprep.subr.bf16.mxu0 %v2716_v1 }
 0x12c   : > { %v873_v36 = vld [vmem:[#allocation3] sm:$0xff]  ;;  %2390 = vmatpush3.bf16.msra.mxu0 %v2608_v35 }
 0x12d   : > { %v874_v39 = vpack.c.bf16 %v873_v36, %v873_v36  ;;  %2391 = vmatprep.subr.bf16.mxu0 %v2716_v1  ;;  %v1295_v3 = vld [vmem:[#allocation3 + $0x2] sm:$0xff] }
 0x12e   : > { %v1296_v5 = vpack.c.bf16 %v1295_v3, %v1295_v3 }
 0x12f   : > { %2384 = vmatmul.mubr.bf16.vlgmr.msra.gmra.mxu1 %v874_v39 }
 0x130   : > { %2408 = vmatpush3.bf16.msra.mxu1 %v2607_v37  ;;  %2392 = vmatpush3.bf16.msra.mxu0 %v2610_v38 }
 0x131   : > { %2409 = vmatprep.subr.bf16.mxu1 %v2716_v1  ;;  %2393 = vmatprep.subr.bf16.mxu0 %v2716_v1 }
 0x132   : > { %2423 = vmatprep.mubr.msk.bf16.mxu1 %vm2717_vm1, %v2716_v1 }
 0x134   : > { %2410 = vmatpush3.bf16.msra.mxu1 %v2609_v40  ;;  %2394 = vmatpush3.bf16.msra.mxu0 %v2612_v41  ;;  %v2105_v40 = vld [vmem:[%s3315_s6] ss:$0 sm:$0xff] }
 0x135   : > { %2411 = vmatprep.subr.bf16.mxu1 %v2716_v1  ;;  %2395 = vmatprep.subr.bf16.mxu0 %v2716_v1 }
 0x138   : > { %2412 = vmatpush3.bf16.msra.mxu1 %v2611_v42  ;;  %2396 = vmatpush3.bf16.msra.mxu0 %v2614_v43 }
 0x139   : > { %2413 = vmatprep.subr.bf16.mxu1 %v2716_v1  ;;  %2397 = vmatprep.subr.bf16.mxu0 %v2716_v1 }
 0x13c   : > { %2414 = vmatpush3.bf16.msra.mxu1 %v2613_v44  ;;  %2398 = vmatpush3.bf16.msra.mxu0 %v2616_v45 }
 0x13d   : > { %2415 = vmatprep.subr.bf16.mxu1 %v2716_v1  ;;  %2399 = vmatprep.subr.bf16.mxu0 %v2716_v1 }
 0x140   : > { %2416 = vmatpush3.bf16.msra.mxu1 %v2615_v46  ;;  %2400 = vmatpush3.bf16.msra.mxu0 %v2618_v47 }
 0x141   : > { %2417 = vmatprep.subr.bf16.mxu1 %v2716_v1  ;;  %2401 = vmatprep.subr.bf16.mxu0 %v2716_v1 }
 0x144   : > { %2418 = vmatpush3.bf16.msra.mxu1 %v2617_v48  ;;  %2402 = vmatpush3.bf16.msra.mxu0 %v2620_v49  ;;  %v2646_v49 = vld [vmem:[%s3316_s7 + $0x58] sm:$0xff]  }
 0x145   : > { %2419 = vmatprep.subr.bf16.mxu1 %v2716_v1  ;;  %2427 = vmatprep.subr.bf16.mxu0 %v2716_v1 }
 0x147   : > { %2404 = vmatmul.mubr.bf16.vlgmr.msra.gmra.mxu0 %v908_v34 }
 0x148   : > { %2420 = vmatpush3.bf16.msra.mxu1 %v2619_v50  ;;  %2428 = vmatpush3.bf16.msra.mxu0 %v2622_v51  ;;  %v2647_v51 = vld [vmem:[%s3316_s7 + $0x78] sm:$0xff]  }
 0x149   : > { %2421 = vmatprep.subr.bf16.mxu1 %v2716_v1  ;;  %2429 = vmatprep.subr.bf16.mxu0 %v2716_v1 }
 0x14a   : > { %2443 = vmatprep.mubr.msk.bf16.mxu0 %vm2717_vm1, %v2716_v1 }
 0x14c   : > { %2422 = vmatpush3.bf16.msra.mxu1 %v2621_v52  ;;  %2430 = vmatpush3.bf16.msra.mxu0 %v2624_v53  ;;  %v2648_v53 = vld [vmem:[%s3316_s7 + $0x50] sm:$0xff]  }
 0x14d   : > { %2447 = vmatprep.subr.bf16.mxu1 %v2716_v1  ;;  %2431 = vmatprep.subr.bf16.mxu0 %v2716_v1 }
 0x14f   : > { %2424 = vmatmul.mubr.bf16.vlgmr.msra.gmra.mxu1 %v874_v39 }
 0x150   : > { %2448 = vmatpush3.bf16.msra.mxu1 %v2623_v54  ;;  %2432 = vmatpush3.bf16.msra.mxu0 %v2626_v55  ;;  %v2649_v54 = vld [vmem:[%s3316_s7 + $0x70] sm:$0xff]   ;;  %v2650_v55 = vld [vmem:[%s3316_s7 + $0x48] sm:$0xff]  }
 0x151   : > { %2449 = vmatprep.subr.bf16.mxu1 %v2716_v1  ;;  %2433 = vmatprep.subr.bf16.mxu0 %v2716_v1 }
 0x152   : > { %2463 = vmatprep.mubr.msk.bf16.mxu1 %vm2717_vm1, %v2716_v1 }
 0x154   : > { %2450 = vmatpush3.bf16.msra.mxu1 %v2625_v56  ;;  %2434 = vmatpush3.bf16.msra.mxu0 %v2628_v57  ;;  %v2651_v56 = vld [vmem:[%s3316_s7 + $0x68] sm:$0xff]   ;;  %v2652_v57 = vld [vmem:[%s3316_s7 + $0x40] sm:$0xff]  }
 0x155   : > { %2451 = vmatprep.subr.bf16.mxu1 %v2716_v1  ;;  %2435 = vmatprep.subr.bf16.mxu0 %v2716_v1 }
 0x158   : > { %2452 = vmatpush3.bf16.msra.mxu1 %v2627_v58  ;;  %2436 = vmatpush3.bf16.msra.mxu0 %v2630_v59  ;;  %v2653_v58 = vld [vmem:[%s3316_s7 + $0x60] sm:$0xff]  }
 0x159   : > { %2453 = vmatprep.subr.bf16.mxu1 %v2716_v1  ;;  %2437 = vmatprep.subr.bf16.mxu0 %v2716_v1 }
 0x15c   : > { %2454 = vmatpush3.bf16.msra.mxu1 %v2629_v60  ;;  %2438 = vmatpush3.bf16.msra.mxu0 %v2632_v61 }
 0x15d   : > { %2455 = vmatprep.subr.bf16.mxu1 %v2716_v1  ;;  %2439 = vmatprep.subr.bf16.mxu0 %v2716_v1 }
 0x160   : > { %2456 = vmatpush3.bf16.msra.mxu1 %v2631_v62  ;;  %2440 = vmatpush3.bf16.msra.mxu0 %v2634_v63 }
 0x161   : > { %2457 = vmatprep.subr.bf16.mxu1 %v2716_v1  ;;  %2441 = vmatprep.subr.bf16.mxu0 %v2716_v1 }
 0x164   : > { %2458 = vmatpush3.bf16.msra.mxu1 %v2633_v0  ;;  %2442 = vmatpush3.bf16.msra.mxu0 %v2636_v2 }
 0x165   : > { %2459 = vmatprep.subr.bf16.mxu1 %v2716_v1  ;;  %2467 = vmatprep.subr.bf16.mxu0 %v2716_v1 }
 0x167   : > { %2444 = vmatmul.mubr.bf16.vlgmr.msra.gmra.mxu0 %v1296_v5 }
 0x168   : > { %2460 = vmatpush3.bf16.msra.mxu1 %v2635_v4  ;;  %2475 = vmatprep.mubr.msk.bf16.mxu0 %vm2717_vm1, %v2716_v1 }
 0x169   : > { %2461 = vmatprep.subr.bf16.mxu1 %v2716_v1  ;;  %2468 = vmatpush3.bf16.msra.mxu0 %v2638_v7 }
 0x16a   : > { %2469 = vmatprep.subr.bf16.mxu0 %v2716_v1 }
 0x16c   : > { %2462 = vmatpush3.bf16.msra.mxu1 %v2637_v6 }
 0x16d   : > { %2479 = vmatprep.subr.bf16.mxu1 %v2716_v1  ;;  %2470 = vmatpush3.bf16.msra.mxu0 %v2640_v9 }
 0x16e   : > { %2471 = vmatprep.subr.bf16.mxu0 %v2716_v1 }
 0x16f   : > { %2464 = vmatmul.mubr.bf16.vlgmr.msra.gmra.mxu1 %v1296_v5 }
 0x170   : > { %2487 = vmatprep.mubr.msk.bf16.mxu1 %vm2717_vm1, %v2716_v1  ;;  %2480 = vmatpush3.bf16.msra.mxu1 %v2639_v8 }
 0x171   : > { %2481 = vmatprep.subr.bf16.mxu1 %v2716_v1  ;;  %2472 = vmatpush3.bf16.msra.mxu0 %v2642_v11 }
 0x172   : > { %2473 = vmatprep.subr.bf16.mxu0 %v2716_v1 }
 0x174   : > { %2482 = vmatpush3.bf16.msra.mxu1 %v2641_v10 }
 0x175   : > { %2483 = vmatprep.subr.bf16.mxu1 %v2716_v1  ;;  %2474 = vmatpush3.bf16.msra.mxu0 %v2644_v13 }
 0x176   : > { %2491 = vmatprep.subr.bf16.mxu0 %v2716_v1 }
 0x178   : > { %2484 = vmatpush3.bf16.msra.mxu1 %v2643_v12 }
 0x179   : > { %2485 = vmatprep.subr.bf16.mxu1 %v2716_v1 }
 0x17c   : > { %2486 = vmatpush3.bf16.msra.mxu1 %v2645_v14 }
 0x17d   : > { %2503 = vmatprep.subr.bf16.mxu1 %v2716_v1 }
 0x1e7   : > { %v1008_v15 = vpop.f32.mrf.mxu0 }
 0x1e9   : > { %v2365_v16 = vpop.f32.mrf.mxu0 }
 0x1eb   : > { %v1011_v17 = vpop.f32.mrf.mxu0 }
 0x1ed   : > { %v2366_v18 = vpop.f32.mrf.mxu0 }
 0x1ef   : > { %v1096_v19 = vpop.f32.mrf.mxu1 }
 0x1f0   : > { %v1097_v35 = vadd.f32 %v1096_v19, %v1008_v15 }
 0x1f1   : > { %v2385_v20 = vpop.f32.mrf.mxu1 }
 0x1f3   : > { %v1099_v21 = vpop.f32.mrf.mxu1 }
 0x1f5   : > { %v2386_v22 = vpop.f32.mrf.mxu1 }
 0x207   : > { %v1201_v23 = vpop.f32.mrf.mxu0 }
 0x209   : > { %v2405_v24 = vpop.f32.mrf.mxu0 }
 0x20b   : > { %v1204_v25 = vpop.f32.mrf.mxu0 }
 0x20d   : > { %v2406_v26 = vpop.f32.mrf.mxu0 }
 0x20f   : > { %v1289_v27 = vpop.f32.mrf.mxu1 }
 0x210   : > { %v1290_v36 = vadd.f32 %v1289_v27, %v1201_v23 }
 0x211   : > { %v2425_v28 = vpop.f32.mrf.mxu1 }
 0x213   : > { %v1292_v29 = vpop.f32.mrf.mxu1 }
 0x215   : > { %v2426_v30 = vpop.f32.mrf.mxu1 }
 0x227   : > { %v1396_v31 = vpop.f32.mrf.mxu0 }
 0x228   : > { %v1402_v38 = vadd.f32 %v1396_v31, %v1097_v35 }
 0x229   : > { %v2445_v32 = vpop.f32.mrf.mxu0 }
 0x22b   : > { %v1399_v33 = vpop.f32.mrf.mxu0 }
 0x22d   : > { %v2446_v34 = vpop.f32.mrf.mxu0 }
 0x22f   : > { %v1502_v37 = vpop.f32.mrf.mxu1 }
 0x230   : > { %v1508_v39 = vadd.f32 %v1502_v37, %v1290_v36 }
 0x231   : > { %v2465_v41 = vpop.f32.mrf.mxu1 }
 0x232   : > { %v1509_v42 = vmax.f32 %v1402_v38, %v1508_v39 }
 0x233   : > { %v1505_v43 = vpop.f32.mrf.mxu1 }
 0x234   : > { %v1517_v44 = vadd.f32 %v2105_v40, %v1509_v42 }
 0x235   : > { %v2466_v45 = vpop.f32.mrf.mxu1 }
 0x236   : > { %1519 = vst.msk [vmem:[#allocation4] sm:$0xff] %vm1518_vm3, %v1517_v44 }
 0x23d   : > { %v1520_v46 = vld [vmem:[#allocation4] ss:$2 sm:$0xf]  ;;  %v1522_v47 = vld [vmem:[#allocation4 + $0x1] ss:$2 sm:$0xf] }
 0x23e   : > { %v1523_v48 = vmax.f32 %v1520_v46, %v1522_v47 }
 0x240   : > { %v1525_v50 = vpack.c.bf16 %v1523_v48, %v1523_v48 }
 0x242   : > { %2476 = vmatmul.mubr.msk.bf16.vlgmr.msra.gmra.mxu0 %vm1518_vm3, %v1525_v50  ;;  %v1611_v52 = vshrl.u32 %v1525_v50, 16  ;;  %v1691_v59 = vrot.slane %v1525_v50, 1 }
 0x243   : > { %2492 = vmatpush3.bf16.msra.mxu0 %v2646_v49  ;;  %2499 = vmatprep.mubr.msk.bf16.mxu0 %vm2717_vm1, %v2716_v1 }
 0x244   : > { %2488 = vmatmul.mubr.msk.bf16.vlgmr.msra.gmra.mxu1 %vm1518_vm3, %v1611_v52  ;;  %2493 = vmatprep.subr.bf16.mxu0 %v2716_v1  ;;  %v1769_v60 = vrot.slane %v1611_v52, 1 }
 0x245   : > { %2504 = vmatpush3.bf16.msra.mxu1 %v2647_v51  ;;  %2511 = vmatprep.mubr.msk.bf16.mxu1 %vm2717_vm1, %v2716_v1 }
 0x246   : > { %2505 = vmatprep.subr.bf16.mxu1 %v2716_v1 }
 0x247   : > { %2494 = vmatpush3.bf16.msra.mxu0 %v2648_v53 }
 0x248   : > { %2495 = vmatprep.subr.bf16.mxu0 %v2716_v1 }
 0x249   : > { %2506 = vmatpush3.bf16.msra.mxu1 %v2649_v54 }
 0x24a   : > { %2507 = vmatprep.subr.bf16.mxu1 %v2716_v1 }
 0x24b   : > { %2496 = vmatpush3.bf16.msra.mxu0 %v2650_v55 }
 0x24c   : > { %2497 = vmatprep.subr.bf16.mxu0 %v2716_v1 }
 0x24d   : > { %2508 = vmatpush3.bf16.msra.mxu1 %v2651_v56 }
 0x24e   : > { %2509 = vmatprep.subr.bf16.mxu1 %v2716_v1  ;;  %v1524_v1 = vld [vmem:[%s3317_s8] sm:$0x1] }
 0x24f   : > { %2498 = vmatpush3.bf16.msra.mxu0 %v2652_v57 }
 0x251   : > { %2510 = vmatpush3.bf16.msra.mxu1 %v2653_v58 }
 0x252   : > { %2500 = vmatmul.mubr.msk.bf16.vlgmr.msra.gmra.mxu0 %vm1518_vm3, %v1691_v59 }
 0x254   : > { %2512 = vmatmul.mubr.msk.bf16.vlgmr.msra.gmra.mxu1 %vm1518_vm3, %v1769_v60 }
 0x302   : > { %v1595_v61 = vpop.f32.mrf.mxu0 }
 0x303   : > { %v1601_v6 = vadd.f32 %v1595_v61, %v1524_v1 }
 0x304   : > { %v2477_v62 = vpop.f32.mrf.mxu0  ;;  %v1674_v63 = vpop.f32.mrf.mxu1 }
 0x305   : > { %v1680_v7 = vadd.f32 %v1674_v63, %v1601_v6 }
 0x306   : > { %v1598_v0 = vpop.f32.mrf.mxu0  ;;  %v2489_v2 = vpop.f32.mrf.mxu1 }
 0x308   : > { %v2478_v3 = vpop.f32.mrf.mxu0  ;;  %v1677_v4 = vpop.f32.mrf.mxu1 }
 0x30a   : > { %v2490_v5 = vpop.f32.mrf.mxu1 }
 0x312   : > { %v1753_v8 = vpop.f32.mrf.mxu0 }
 0x313   : > { %v1759_v9 = vadd.f32 %v1753_v8, %v1680_v7 }
 0x314   : > { %v2501_v10 = vpop.f32.mrf.mxu0  ;;  %v1831_v11 = vpop.f32.mrf.mxu1 }
 0x315   : > { %v1837_v12 = vadd.f32 %v1831_v11, %v1759_v9 }
 0x316   : > { %v1756_v13 = vpop.f32.mrf.mxu0  ;;  %v2513_v14 = vpop.f32.mrf.mxu1 }
 0x317   : > { %1839 = vst.msk [vmem:[%s324_s21] sm:$0x1] %vm1838_vm4, %v1837_v12 }
 0x318   : > { %v2502_v15 = vpop.f32.mrf.mxu0  ;;  %v1834_v16 = vpop.f32.mrf.mxu1 }
 0x319   : > { %2667 = shalt.err (!%p2664_p3)
}
 0x31a   : > { %s2668_s27 = scalar_lea.hbm %s3268_s25, 16  ;;  %s2672_s21 = scalar_lea.hbm %s3318_s9, 32 }
 0x31b   : > { %p2669_p4 = scmp.ne.s32.totalorder %s3268_s25, %s2668_s27  ;;  %p2673_p9 = scmp.lt.s32.totalorder %s3268_s25, %s3318_s9 }
 0x31c   : > { %p2674_p10 = scmp.lt.s32.totalorder %s2672_s21, %s2668_s27 }
 0x31d   : > { %p2670_p7 = pnand %p2669_p4, %p2807_p5 }
 0x31e   : > { %p2675_p11 = por %p2674_p10, %p2673_p9 }
 0x31f   : > { %p2671_p8 = pneg %p2670_p7 }
 0x321   : > { %p2676_p12 = pnand %p2675_p11, %p2671_p8 }
 0x323   : > { %2679 = shalt.err (!%p2676_p12)
}
 0x324   : > { %2516 = dma.vmem_to_hbm [thread:$0]  (%p2807_p5), %s3270_s22, 16, %s3268_s25, %s1841_s13   ;;  %v2514_v17 = vpop.f32.mrf.mxu1 }
 0x325 PF: > { %p2522_p13 = scmp.ge.s32.totalorder %s2714_s12, 2  ;;  %s1865_s26 = sand.u32 1, %s2702_s30  }
 0x326   : > { %s1866_s28 = scalar_lea.sflag [#allocation6], %s1865_s26 }
 0x327   : > { %p2519_p0 = pnand %p2522_p13, %p2811_p6 }
 0x329   : > { %p2520_p1 = pneg %p2519_p0 }
 0x32b   : > { %2697 = dma.done.wait (%p2520_p1), %s1866_s28, 16  }
 0x32c   : > { %2699 = vsyncadd (%p2520_p1), %s1866_s28, 4294967280  ;;  %p19_p2 = scmp.ge.s32.totalorder %s2794_s15, 4   ;;  %s3321_s30 = smov %s2706_s10 }
 0x32d   : > { %s3322_s10 = smov %s2710_s11  ;;  %s3323_s11 = smov %s2805_s18 }
 0x32e   : > { %s3324_s12 = smov %s2794_s15  ;;  %21 = sbr.rel (!%p19_p2) target bundleno = 3 (0x3), region = 106 }
 0x333   :  { %1870 = vsyncpa [#allocation6], 1 }
 0x334   :  { %1872 = vsyncpa [#allocation6 + $0x1], 1 }

</bundles_post_ra>
